<compile_context>
chip_gen: v5e
topology: v5e:2x2
jax: 0.10.0
libtpu: 0.0.40
codegen_flags: <defaults>
</compile_context>

<pallas_src>
import functools

import jax
import jax.numpy as jnp
from jax.experimental import pallas as pl
from jax.experimental.pallas import tpu as pltpu

BN_EPS = 1e-5        # torch.nn.BatchNorm2d default eps
NORM_EPS = 1e-12     # torch.nn.functional.normalize default eps
_MAX_TILE_LANES = 65536


def _stats_kernel(x_ref, w1_ref, b1_ref, hsum_ref, hsq_ref, *, rem):
    """Pass A: per-image partial sum / sum-of-squares of h = W1 @ x + b1.

    rem == 0  -> H*W divides evenly into tiles, no masking anywhere.
    rem  > 0  -> only the last tile along H*W is ragged; mask it (select-based,
                 since out-of-bounds lanes of the input block hold garbage).
    """
    j = pl.program_id(1)

    @pl.when(j == 0)
    def _():
        hsum_ref[...] = jnp.zeros_like(hsum_ref)
        hsq_ref[...] = jnp.zeros_like(hsq_ref)

    # (Cin, Cin) @ (Cin, thw) -> (Cin, thw): 1x1 conv as an MXU matmul.
    h = jnp.dot(w1_ref[...], x_ref[...],
                preferred_element_type=jnp.float32) + b1_ref[...]

    if rem == 0:
        hsum_ref[...] += jnp.sum(h, axis=1, keepdims=True)
        hsq_ref[...] += jnp.sum(h * h, axis=1, keepdims=True)
    else:
        is_last = j == pl.num_programs(1) - 1

        @pl.when(jnp.logical_not(is_last))
        def _():
            hsum_ref[...] += jnp.sum(h, axis=1, keepdims=True)
            hsq_ref[...] += jnp.sum(h * h, axis=1, keepdims=True)

        @pl.when(is_last)
        def _():
            col = jax.lax.broadcasted_iota(jnp.int32, h.shape, 1)
            hm = jnp.where(col < rem, h, 0.0)   # select, not multiply (garbage lanes)
            hsum_ref[...] += jnp.sum(hm, axis=1, keepdims=True)
            hsq_ref[...] += jnp.sum(hm * hm, axis=1, keepdims=True)


def _apply_kernel(x_ref, w1_ref, b1_ref, w2_ref, b2_ref, o_ref):
    """Pass B: BN-folded conv1, ReLU, conv2, L2-normalize over channels."""
    h = jnp.dot(w1_ref[...], x_ref[...],
                preferred_element_type=jnp.float32) + b1_ref[...]
    h = jnp.maximum(h, 0.0)                                     # ReLU
    y = jnp.dot(w2_ref[...], h,
                preferred_element_type=jnp.float32) + b2_ref[...]
    # F.normalize(y, p=2, dim=channel) == y / max(||y||_2, eps); channels = sublanes.
    sq = jnp.sum(y * y, axis=0, keepdims=True)                  # (1, thw)
    inv = jax.lax.rsqrt(jnp.maximum(sq, NORM_EPS * NORM_EPS))
    o_ref[...] = y * inv                                        # lane-dense store


def _tile_and_vmem(cin, e, hw, tile_hw_override=None):
    """Pick the H*W tile from the VMEM budget and return (tile, vmem_limit_bytes)."""
    try:
        phys = pltpu.get_tpu_info().vmem_capacity_bytes
    except Exception:
        phys = 64 << 20                       # conservative (v7x-sized) default
    # <=48 MiB scoped limit on 64-MiB-VMEM chips (v7x), <=64 MiB on 128-MiB chips.
    cap = int(min(phys * 3 // 4, 64 << 20))
    # Per-lane f32 bytes: double-buffered input+output blocks + in-kernel temporaries
    # (h, h*h in pass A; h, y, y*y in pass B) ~ (2*(Cin+E) + 2*Cin + 2*E) * 4.
    bytes_per_lane = 4 * (2 * (cin + e) + 2 * cin + 2 * e)
    param_bytes = 8 * (cin * cin + e * cin + 4 * cin + 2 * e)
    headroom = 2 << 20
    max_lanes = max((cap - param_bytes - headroom) // bytes_per_lane, 128)
    max_lanes = min(max_lanes, _MAX_TILE_LANES)

    if tile_hw_override is not None:
        thw = min(int(tile_hw_override), hw)
    elif hw <= max_lanes:
        thw = hw                              # full-extent last dim: no ragged tile
    else:
        thw = (max_lanes // 128) * 128        # lane-aligned tile, ragged tail masked

    need = bytes_per_lane * thw + param_bytes + headroom
    vmem_limit = int(min(max(need, 4 << 20), cap))
    return thw, vmem_limit


def project_head_forward(x_nchw, params, *, tile_hw=None):
    """x_nchw: (N, Cin, H, W) float32 -> (N, E, H, W) float32 (train-mode BN)."""
    w1, b1, gamma, beta, w2, b2 = params
    N, Cin, H, W = x_nchw.shape
    E = w2.shape[0]
    HW = H * W
    M = N * HW

    # Free view: channels on sublanes, pixels on lanes, batch on the grid.
    x3 = x_nchw.reshape(N, Cin, HW)

    thw, vmem_limit = _tile_and_vmem(Cin, E, HW, tile_hw)
    jb = pl.cdiv(HW, thw)
    rem = HW % thw                             # valid lanes in the last tile (0 = even)
    grid = (N, jb)

    x_spec = pl.BlockSpec((pl.Squeezed(), Cin, thw), lambda n, j: (n, 0, j))
    const = lambda shape: pl.BlockSpec(shape, lambda n, j: (0, 0))
    part_spec = pl.BlockSpec((pl.Squeezed(), Cin, 1), lambda n, j: (n, 0, 0))

    # ---- Pass A: per-image partial BatchNorm moments (j axis is the reduction). ----
    hsum_p, hsq_p = pl.pallas_call(
        functools.partial(_stats_kernel, rem=rem),
        out_shape=(jax.ShapeDtypeStruct((N, Cin, 1), jnp.float32),
                   jax.ShapeDtypeStruct((N, Cin, 1), jnp.float32)),
        grid=grid,
        in_specs=[x_spec, const((Cin, Cin)), const((Cin, 1))],
        out_specs=(part_spec, part_spec),
        compiler_params=pltpu.CompilerParams(
            dimension_semantics=("parallel", "arbitrary"),
            vmem_limit_bytes=vmem_limit),
    )(x3, w1, b1)

    # ---- Tiny XLA step: reduce partials, fold BN into the first conv. ----
    hsum = jnp.sum(hsum_p, axis=0)             # (Cin, 1)
    hsq = jnp.sum(hsq_p, axis=0)
    mean = hsum / M
    var = jnp.maximum(hsq / M - mean * mean, 0.0)   # biased train-mode variance
    inv_std = jax.lax.rsqrt(var + BN_EPS)
    scale = gamma * inv_std
    shift = beta - mean * scale
    w1f = scale * w1                           # BN folded into conv1 weights
    b1f = scale * b1 + shift                   # and bias

    # ---- Pass B: apply pass (fully parallel / megacore shardable). ----
    out3 = pl.pallas_call(
        _apply_kernel,
        out_shape=jax.ShapeDtypeStruct((N, E, HW), jnp.float32),
        grid=grid,
        in_specs=[x_spec, const((Cin, Cin)), const((Cin, 1)),
                  const((E, Cin)), const((E, 1))],
        out_specs=pl.BlockSpec((pl.Squeezed(), E, thw), lambda n, j: (n, 0, j)),
        compiler_params=pltpu.CompilerParams(
            dimension_semantics=("parallel", "parallel"),
            vmem_limit_bytes=vmem_limit),
    )(x3, w1f, b1f, w2, b2)

    return out3.reshape(N, E, H, W)            # free view back to NCHW


def init_params(key, in_dim, embedding_dim):
    """Deterministic synthetic parameters (conv weights stored as (out, in))."""
    k1, k2, k3, k4, k5, k6 = jax.random.split(key, 6)
    w1 = jax.random.normal(k1, (in_dim, in_dim), jnp.float32) * 0.1
    b1 = jax.random.normal(k2, (in_dim, 1), jnp.float32) * 0.1
    gamma = 1.0 + 0.1 * jax.random.normal(k3, (in_dim, 1), jnp.float32)
    beta = 0.1 * jax.random.normal(k4, (in_dim, 1), jnp.float32)
    w2 = jax.random.normal(k5, (embedding_dim, in_dim), jnp.float32) * 0.1
    b2 = jax.random.normal(k6, (embedding_dim, 1), jnp.float32) * 0.1
    return w1, b1, gamma, beta, w2, b2


def project_head_ref(x_nchw, params):
    """Pure-JAX reference mirroring the PyTorch forward (train-mode BN)."""
    w1, b1, gamma, beta, w2, b2 = params
    N, Cin, H, W = x_nchw.shape
    x2d = jnp.transpose(x_nchw, (1, 0, 2, 3)).reshape(Cin, -1)
    h = w1 @ x2d + b1
    mean = jnp.mean(h, axis=1, keepdims=True)
    var = jnp.mean((h - mean) ** 2, axis=1, keepdims=True)
    h = (h - mean) / jnp.sqrt(var + BN_EPS) * gamma + beta
    h = jnp.maximum(h, 0.0)
    y = w2 @ h + b2
    nrm = jnp.sqrt(jnp.sum(y * y, axis=0, keepdims=True))
    y = y / jnp.maximum(nrm, NORM_EPS)
    E = w2.shape[0]
    return jnp.transpose(y.reshape(E, N, H, W), (1, 0, 2, 3))


if __name__ == "__main__":
    in_dim, embedding_dim = 8, 16
    N, H, W = 2, 20, 20   # HW = 400

    key = jax.random.PRNGKey(0)
    kx, kp = jax.random.split(key)
    x = jax.random.normal(kx, (N, in_dim, H, W), jnp.float32)
    params = init_params(kp, in_dim, embedding_dim)

    ref = jax.block_until_ready(project_head_ref(x, params))

    # Default path: full-extent H*W tile (single tile per image, no masking).
    out = jax.block_until_ready(project_head_forward(x, params))
    assert out.shape == (N, embedding_dim, H, W)
    assert jnp.allclose(out, ref, atol=1e-4, rtol=1e-4), \
        float(jnp.max(jnp.abs(out - ref)))

    # Forced small tile: exercises the multi-tile grid and the ragged-last-tile
    # masking / dropped-OOB-store path.
    out_t = jax.block_until_ready(project_head_forward(x, params, tile_hw=128))
    assert jnp.allclose(out_t, ref, atol=1e-4, rtol=1e-4), \
        float(jnp.max(jnp.abs(out_t - ref)))

    print("KERNEL_OK")
</pallas_src>

<mosaic_0001>
module attributes {stable_mosaic.version = 11 : i64} {
  func.func @_stats_kernel(%arg0: i32, %arg1: i32, %arg2: memref<1x8x400xf32, #tpu.memory_space<vmem>>, %arg3: memref<8x8xf32, #tpu.memory_space<vmem>>, %arg4: memref<8x1xf32, #tpu.memory_space<vmem>>, %arg5: memref<1x8x1xf32, #tpu.memory_space<vmem>>, %arg6: memref<1x8x1xf32, #tpu.memory_space<vmem>>) attributes {dimension_semantics = [#tpu.dimension_semantics<parallel>, #tpu.dimension_semantics<arbitrary>], iteration_bounds = array<i64: 2, 1>, scalar_prefetch = 0 : i64, scratch_operands = 0 : i64, tpu.core_type = #tpu.core_type<tc>, window_params = [{transform_indices = @transform_0, window_bounds = array<i64: 1, 8, 400>}, {pipeline_mode = #tpu.pipeline_mode<synchronous>, transform_indices = @transform_1, window_bounds = array<i64: 8, 8>}, {pipeline_mode = #tpu.pipeline_mode<synchronous>, transform_indices = @transform_2, window_bounds = array<i64: 8, 1>}, {transform_indices = @transform_3, window_bounds = array<i64: 1, 8, 1>}, {transform_indices = @transform_4, window_bounds = array<i64: 1, 8, 1>}]} {
    %c0_i32 = arith.constant 0 : i32
    %0 = arith.cmpi eq, %arg1, %c0_i32 : i32
    %1 = arith.extui %0 : i1 to i32
    %c0_i32_0 = arith.constant 0 : i32
    %2 = arith.cmpi ne, %1, %c0_i32_0 : i32
    scf.if %2 {
      %cst_21 = arith.constant 0.000000e+00 : f32
      %27 = vector.broadcast %cst_21 : f32 to vector<8x1xf32>
      %c0_22 = arith.constant 0 : index
      %c0_23 = arith.constant 0 : index
      %c0_24 = arith.constant 0 : index
      %28 = vector.load %arg5[%c0_22, %c0_23, %c0_24] : memref<1x8x1xf32, #tpu.memory_space<vmem>>, vector<1x8x1xf32>
      %29 = vector.shape_cast %28 : vector<1x8x1xf32> to vector<8x1xf32>
      %30 = vector.shape_cast %27 : vector<8x1xf32> to vector<1x8x1xf32>
      tpu.vector_store %arg5[%c0_22, %c0_23, %c0_24], %30 {strides = array<i32>} : memref<1x8x1xf32, #tpu.memory_space<vmem>>, vector<1x8x1xf32>,
      %cst_25 = arith.constant 0.000000e+00 : f32
      %31 = vector.broadcast %cst_25 : f32 to vector<8x1xf32>
      %c0_26 = arith.constant 0 : index
      %c0_27 = arith.constant 0 : index
      %c0_28 = arith.constant 0 : index
      %32 = vector.load %arg6[%c0_26, %c0_27, %c0_28] : memref<1x8x1xf32, #tpu.memory_space<vmem>>, vector<1x8x1xf32>
      %33 = vector.shape_cast %32 : vector<1x8x1xf32> to vector<8x1xf32>
      %34 = vector.shape_cast %31 : vector<8x1xf32> to vector<1x8x1xf32>
      tpu.vector_store %arg6[%c0_26, %c0_27, %c0_28], %34 {strides = array<i32>} : memref<1x8x1xf32, #tpu.memory_space<vmem>>, vector<1x8x1xf32>,
    } else {
    }
    %c0 = arith.constant 0 : index
    %c0_1 = arith.constant 0 : index
    %3 = vector.load %arg3[%c0, %c0_1] : memref<8x8xf32, #tpu.memory_space<vmem>>, vector<8x8xf32>
    %c0_2 = arith.constant 0 : index
    %c0_3 = arith.constant 0 : index
    %c0_4 = arith.constant 0 : index
    %4 = vector.load %arg2[%c0_2, %c0_3, %c0_4] : memref<1x8x400xf32, #tpu.memory_space<vmem>>, vector<1x8x400xf32>
    %5 = vector.shape_cast %4 : vector<1x8x400xf32> to vector<8x400xf32>
    %cst = arith.constant dense<0.000000e+00> : vector<8x400xf32>
    %6 = tpu.matmul %3, %5, %cst {dimension_numbers = #tpu.dot_dimension_numbers<[1], [0], [0], [1], [0, 0, 1, 1], [], []>} : vector<8x8xf32>, vector<8x400xf32>, vector<8x400xf32> -> vector<8x400xf32>
    %c0_5 = arith.constant 0 : index
    %c0_6 = arith.constant 0 : index
    %7 = vector.load %arg4[%c0_5, %c0_6] : memref<8x1xf32, #tpu.memory_space<vmem>>, vector<8x1xf32>
    %8 = vector.broadcast %7 : vector<8x1xf32> to vector<8x400xf32>
    %9 = arith.addf %6, %8 : vector<8x400xf32>
    %c0_7 = arith.constant 0 : index
    %c0_8 = arith.constant 0 : index
    %c0_9 = arith.constant 0 : index
    %10 = vector.load %arg5[%c0_7, %c0_8, %c0_9] : memref<1x8x1xf32, #tpu.memory_space<vmem>>, vector<1x8x1xf32>
    %11 = vector.shape_cast %10 : vector<1x8x1xf32> to vector<8x1xf32>
    %cst_10 = arith.constant dense<0.000000e+00> : vector<8xf32>
    %12 = vector.multi_reduction <add>, %9, %cst_10 [1] : vector<8x400xf32> to vector<8xf32>
    %13 = vector.shape_cast %12 : vector<8xf32> to vector<8x1xf32>
    %14 = arith.addf %11, %13 : vector<8x1xf32>
    %c0_11 = arith.constant 0 : index
    %c0_12 = arith.constant 0 : index
    %c0_13 = arith.constant 0 : index
    %15 = vector.load %arg5[%c0_11, %c0_12, %c0_13] : memref<1x8x1xf32, #tpu.memory_space<vmem>>, vector<1x8x1xf32>
    %16 = vector.shape_cast %15 : vector<1x8x1xf32> to vector<8x1xf32>
    %17 = vector.shape_cast %14 : vector<8x1xf32> to vector<1x8x1xf32>
    tpu.vector_store %arg5[%c0_11, %c0_12, %c0_13], %17 {strides = array<i32>} : memref<1x8x1xf32, #tpu.memory_space<vmem>>, vector<1x8x1xf32>,
    %c0_14 = arith.constant 0 : index
    %c0_15 = arith.constant 0 : index
    %c0_16 = arith.constant 0 : index
    %18 = vector.load %arg6[%c0_14, %c0_15, %c0_16] : memref<1x8x1xf32, #tpu.memory_space<vmem>>, vector<1x8x1xf32>
    %19 = vector.shape_cast %18 : vector<1x8x1xf32> to vector<8x1xf32>
    %20 = arith.mulf %9, %9 : vector<8x400xf32>
    %cst_17 = arith.constant dense<0.000000e+00> : vector<8xf32>
    %21 = vector.multi_reduction <add>, %20, %cst_17 [1] : vector<8x400xf32> to vector<8xf32>
    %22 = vector.shape_cast %21 : vector<8xf32> to vector<8x1xf32>
    %23 = arith.addf %19, %22 : vector<8x1xf32>
    %c0_18 = arith.constant 0 : index
    %c0_19 = arith.constant 0 : index
    %c0_20 = arith.constant 0 : index
    %24 = vector.load %arg6[%c0_18, %c0_19, %c0_20] : memref<1x8x1xf32, #tpu.memory_space<vmem>>, vector<1x8x1xf32>
    %25 = vector.shape_cast %24 : vector<1x8x1xf32> to vector<8x1xf32>
    %26 = vector.shape_cast %23 : vector<8x1xf32> to vector<1x8x1xf32>
    tpu.vector_store %arg6[%c0_18, %c0_19, %c0_20], %26 {strides = array<i32>} : memref<1x8x1xf32, #tpu.memory_space<vmem>>, vector<1x8x1xf32>,
    return
  }
  func.func @transform_0(%arg0: i32, %arg1: i32) -> (i32, i32, i32) {
    %c0_i32 = arith.constant 0 : i32
    %c0_i32_0 = arith.constant 0 : i32
    return %arg0, %c0_i32, %arg1 : i32, i32, i32
  }
  func.func @transform_1(%arg0: i32, %arg1: i32) -> (i32, i32) {
    %c0_i32 = arith.constant 0 : i32
    %c0_i32_0 = arith.constant 0 : i32
    %c0_i32_1 = arith.constant 0 : i32
    return %c0_i32, %c0_i32_0 : i32, i32
  }
  func.func @transform_2(%arg0: i32, %arg1: i32) -> (i32, i32) {
    %c0_i32 = arith.constant 0 : i32
    %c0_i32_0 = arith.constant 0 : i32
    %c0_i32_1 = arith.constant 0 : i32
    return %c0_i32, %c0_i32_0 : i32, i32
  }
  func.func @transform_3(%arg0: i32, %arg1: i32) -> (i32, i32, i32) {
    %c0_i32 = arith.constant 0 : i32
    %c0_i32_0 = arith.constant 0 : i32
    %c0_i32_1 = arith.constant 0 : i32
    return %arg0, %c0_i32, %c0_i32_0 : i32, i32, i32
  }
  func.func @transform_4(%arg0: i32, %arg1: i32) -> (i32, i32, i32) {
    %c0_i32 = arith.constant 0 : i32
    %c0_i32_0 = arith.constant 0 : i32
    %c0_i32_1 = arith.constant 0 : i32
    return %arg0, %c0_i32, %c0_i32_0 : i32, i32, i32
  }
}

</mosaic_0001>

<bundles_post_ra>
// kernel: tpu_custom_call.1
= control target key start
LH: loop header
LB: loop body
LE: loop exit
PB: predicated region body
PF: predicated region fallthrough
CT: control target
= control target key end

     0   :  { %10 = vsyncpa [#allocation3], 0  ;;  %s773_s0 = inlined_call_operand.hbm [shape: f32[2,8,400], index: 0, kind: input, shape index: {}]   ;;  %s774_s1 = inlined_call_operand.vmem [shape: f32[8,8], index: 1, kind: input, shape index: {}]   ;;  %s775_s2 = inlined_call_operand.vmem [shape: f32[8,1], index: 2, kind: input, shape index: {}]   ;;  %s776_s3 = inlined_call_operand.vmem [shape: f32[2,8,1], index: 3, kind: output, shape index: {0}]   ;;  %s777_s4 = inlined_call_operand.vmem [shape: f32[2,8,1], index: 4, kind: output, shape index: {1}]  }
   0x1   :  { %12 = vsyncpa [#allocation3 + $0x1], 0  ;;  %s662_s15 = smov 0   ;;  %s664_s16 = smov 0  }
   0x2   :  { %s666_s17 = smov 0   ;;  %s668_s18 = smov 0  }
   0x3   :  { %s670_s19 = smov 0   ;;  %s672_s20 = smov 0  }
   0x4 LB: > { %s477_s21 = sadd.s32 4294967295, %s633_s20   ;;  %s30_s22 = sadd.s32 1, %s629_s19  ;;  %s633_s20 = sphi %s672_s20, %s18_s20   ;;  %s629_s19 = sphi %s670_s19, %s784_s19   ;;  %s625_s18 = sphi %s668_s18, %s783_s18   ;;  %s621_s17 = sphi %s666_s17, %s782_s17   ;;  %s617_s16 = sphi %s664_s16, %s781_s16   ;;  %s613_s15 = sphi %s662_s15, %s780_s15  }
   0x5   : > { %p32_p0 = scmp.ge.s32.totalorder %s30_s22, 2  ;;  %s39_s23 = sadd.s32 1, %s621_s17 }
   0x6   : > { %p46_p1 = scmp.ne.s32.totalorder %s621_s17, %s617_s16  ;;  %p47_p2 = scmp.eq.s32.totalorder %s633_s20, 0 }
   0x7   : > { %s786_s22 = smov (%p32_p0, %s30_s22), 0  ;;  %p52_p4 = scmp.ne.s32.totalorder %s617_s16, %s613_s15 }
   0x8   : > { %p698_p3 = por %p47_p2, %p46_p1  ;;  %s34_s25 = ssub.s32 %s629_s19, %s786_s22 }
   0x9   : > { %p53_p5 = scmp.eq.s32.totalorder %s477_s21, 0  ;;  %p37_p6 = scmp.eq.s32.totalorder %s34_s25, 0 }
   0xa   : > { %p501_p8 = scmp.lt.s32.totalorder %s633_s20, 2  ;;  %s176_s28 = sand.u32 1, %s621_s17  }
   0xb   : > { %p705_p7 = por %p53_p5, %p52_p4  ;;  %s494_s29 = sshll.u32 %s629_s19, 5 }
   0xc   : > { %s711_s27 = scalar_select %p37_p6, %s621_s17, %s39_s23  }
   0xd   : > { %s481_s30 = sshll.u32 %s176_s28, 5  ;;  %s187_s7 = scalar_lea.hbm %s773_s0, %s494_s29 }
   0xe   : > { %s189_s8 = sshll.u32 %s187_s7, 4  ;;  %s180_s9 = scalar_lea.vmem [#allocation2], %s481_s30  ;;  %s190_s8 = int_to_ptr.hbm [resolvable:$true] %s189_s8 }
   0xf   : > { %s191_s10 = sshll.u32 %s180_s9, 4  ;;  %p498_p9 = pnand %p501_p8, %p698_p3  ;;  %s192_s10 = int_to_ptr.vmem [resolvable:$true] %s191_s10 }
  0x10   : > { %p484_p10 = scmp.ge.s32.totalorder %s633_s20, 1  ;;  %p196_p11 = scmp.lt.s32.totalorder %s633_s20, 3 }
  0x11   : > { %s177_s11 = scalar_lea.sflag [#allocation3], %s176_s28 }
  0x12   : > { %500 = dma.hbm_to_vmem [thread:$0]  (!%p498_p9), %s190_s8, 512, %s192_s10, %s177_s11  }
  0x13   : > { %p197_p12 = pnand %p484_p10, %p196_p11 }
  0x14   : > { %s202_s12 = sand.u32 (!%p197_p12), 1, %s617_s16  }
  0x15   : > { %200 = sbr.rel (%p197_p12) target bundleno = 288 (0x120), region = 32  ;;  %s485_s13 = sshll.u32 (!%p197_p12), %s202_s12, 5 }
  0x16   : > { %s203_s14 = scalar_lea.sflag (!%p197_p12), [#allocation3], %s202_s12  ;;  %s206_s15 = scalar_lea.vmem (!%p197_p12), [#allocation2], %s485_s13 }
  0x1a   : > { %608 = dma.done.wait (%p705_p7), %s203_s14, 512  }
  0x1b   : > { %610 = vsyncadd (%p705_p7), %s203_s14, 4294966784  ;;  %v635_v0 = vmov 0   ;;  %vm262_vm0 = vcmask 64512   ;;  %v254_v1 = vld [vmem:[%s206_s15 + $0x10] sm:$0xff]  ;;  %v255_v2 = vld [vmem:[%s206_s15 + $0x18] sm:$0xff]  ;;  %p236_p13 = scmp.lt.s32.totalorder %s625_s18, 1 }
  0x1c   : > { %552 = vset.pattern.permute.xlu0 %v635_v0  ;;  %v251_v3 = vld [vmem:[%s774_s1] sm:$0xff]  ;;  %321 = vmatpush.msra.mxu2 %v254_v1  ;;  %v253_v5 = vld [vmem:[%s206_s15 + $0x8] sm:$0xff]  ;;  %vm248_vm1 = vcmask 7168   ;;  %v636_v7 = vmov 0.0   ;;  %vm349_vm2 = vcmask 130048  }
  0x1d   : > { %341 = vmatpush.msra.mxu3 %v255_v2  ;;  %v252_v4 = vld [vmem:[%s206_s15] sm:$0xff]  ;;  %490 = vmatmul.msk.f32.vlgmr.msra.gmra.mxu2 %vm262_vm0, %v251_v3  ;;  %s788_s18 = smov (!%p236_p13, %s625_s18), 1 }
  0x1e   : > { %491 = vmatmul.msk.f32.vlgmr.msra.gmra.mxu3 %vm262_vm0, %v251_v3  ;;  %v256_v6 = vld [vmem:[%s775_s2] sm:$0xff]  ;;  %281 = vmatpush.msra.mxu0 %v252_v4  ;;  %s486_s26 = sshll.u32 %s788_s18, 3 }
  0x1f   : > { %301 = vmatpush.msra.mxu1 %v253_v5  ;;  %488 = vmatmul.msk.f32.vlgmr.msra.gmra.mxu0 %vm262_vm0, %v251_v3  ;;  %s738_s30 = scalar_lea.vmem %s776_s3, %s486_s26  ;;  %s745_s7 = scalar_lea.vmem %s777_s4, %s486_s26 }
  0x20   : > { %489 = vmatmul.msk.f32.vlgmr.msra.gmra.mxu1 %vm262_vm0, %v251_v3  ;;  %259 = vperm.xlu0 %552, %v256_v6   ;;  %249 = vst.msk [vmem:[%s738_s30] sm:$0xff] %vm248_vm1, %v636_v7 }
  0x21   : > { %250 = vst.msk [vmem:[%s745_s7] sm:$0xff] %vm248_vm1, %v636_v7 }
  0x27   : > { %v346_v29 = vld [vmem:[%s738_s30] sm:$0xff] }
  0x28   : > { %v357_v31 = vld [vmem:[%s745_s7] sm:$0xff] }
  0x92   : > { %v260_v8 = vpop.permute.xlu0 %259 }
  0x9c   : > { %v283_v9 = vpop.f32.mrf.mxu0 }
  0x9d   : > { %v303_v10 = vpop.f32.mrf.mxu1  ;;  %v284_v11 = vadd.f32 %v283_v9, %v260_v8 }
  0x9e   : > { %v304_v12 = vadd.f32 %v303_v10, %v260_v8 }
  0x9f   : > { %v358_v13 = vmul.f32 %v284_v11, %v284_v11 }
  0xa0   : > { %v347_v14 = vadd.f32 %v304_v12, %v284_v11  ;;  %v359_v15 = vmul.f32 %v304_v12, %v304_v12  ;;  %v323_v16 = vpop.f32.mrf.mxu2 }
  0xa1   : > { %v343_v17 = vpop.f32.mrf.mxu3  ;;  %v324_v18 = vadd.f32 %v323_v16, %v260_v8 }
  0xa2   : > { %v344_v19 = vadd.f32 %v343_v17, %v260_v8  ;;  %v362_v20 = vadd.f32 %v359_v15, %v358_v13 }
  0xa3   : > { %v348_v21 = vadd.f32 %v347_v14, %v324_v18  ;;  %v360_v22 = vmul.f32 %v324_v18, %v324_v18 }
  0xa4   : > { %v361_v23 = vmul.f32 %v344_v19, %v344_v19  ;;  %v350_v24 = vsel %vm349_vm2, %v344_v19, 0.0 }
  0xa5   : > { %v351_v25 = vadd.f32 %v350_v24, %v348_v21  ;;  %v363_v26 = vadd.f32 %v362_v20, %v360_v22 }
  0xa6   : > { %v364_v27 = vsel %vm349_vm2, %v361_v23, 0.0 }
  0xa7   : > { %352 = vadd.xlane.f32.xlu0 %v351_v25  ;;  %v365_v28 = vadd.f32 %v364_v27, %v363_v26 }
  0xa9   : > { %366 = vadd.xlane.f32.xlu1 %v365_v28 }
 0x11a   : > { %v353_v30 = vpop.xlane.xlu0 %352 }
 0x11b   : > { %v354_v32 = vadd.f32 %v353_v30, %v346_v29 }
 0x11c   : > { %v367_v33 = vpop.xlane.xlu1 %366 }
 0x11d   : > { %356 = vst.msk [vmem:[%s738_s30] sm:$0xff] %vm248_vm1, %v354_v32  ;;  %v368_v34 = vadd.f32 %v367_v33, %v357_v31 }
 0x11f   : > { %369 = vst.msk [vmem:[%s745_s7] sm:$0xff] %vm248_vm1, %v368_v34 }
 0x120 PF: > { %s18_s20 = sadd.s32 1, %s633_s20   ;;  %s780_s15 = smov %s617_s16 }
 0x121   : > { %p15_p0 = scmp.ge.s32.totalorder %s18_s20, 4   ;;  %s781_s16 = smov %s621_s17 }
 0x122   : > { %s782_s17 = smov %s711_s27  ;;  %s783_s18 = smov %s629_s19 }
 0x123   : > { %s784_s19 = smov %s786_s22  ;;  %17 = sbr.rel (!%p15_p0) target bundleno = 4 (0x4), region = 88 }
 0x128   :  { %403 = vsyncpa [#allocation3], 1 }
 0x129   :  { %405 = vsyncpa [#allocation3 + $0x1], 1 }

</bundles_post_ra>
